<compile_context>
chip_gen: v7x
topology: tpu7x:2x2x1
jax: 0.10.0
libtpu: 0.0.40
codegen_flags: <defaults>
</compile_context>

<pallas_src>
import functools

import jax
import jax.numpy as jnp
from jax.experimental import pallas as pl
from jax.experimental.pallas import tpu as pltpu


def _round_up(x: int, m: int) -> int:
    return (x + m - 1) // m * m


# ---------------------------------------------------------------------------
# Fused Pallas kernel: the whole MLP for one batch tile.
#   refs[0]        : x_ref  (TILE_M, IN_PAD)   f32 activations (lane-dense)
#   refs[1:-1]     : w0, b0, w1, b1, ...       per-layer padded weights (bf16)
#                                              and biases (f32, shape (1, OUT_PAD_l))
#   refs[-1]       : o_ref  (TILE_M, OUT_PAD)  padded output (real cols = [:out_dim])
# ---------------------------------------------------------------------------
def _fcnn_fused_kernel(*refs):
    x_ref, o_ref = refs[0], refs[-1]
    wb_refs = refs[1:-1]
    n_dense = len(wb_refs) // 2

    h = x_ref[...]                                       # f32 (TILE_M, IN_PAD)
    for li in range(n_dense):                            # static unroll over layers
        w_ref = wb_refs[2 * li]
        b_ref = wb_refs[2 * li + 1]
        # bf16 operands -> native MXU path; f32 accumulation.
        acc = jnp.dot(h.astype(w_ref.dtype), w_ref[...],
                      preferred_element_type=jnp.float32)
        h = acc + b_ref[...]                             # f32 epilogue (bias broadcast)
        if li != n_dense - 1:
            h = jnp.maximum(h, 0.0)                      # ReLU on hidden layers only
            # TODO(synk): if the real FullyConnected uses a different activation
            # (e.g. tanh) or applies it on the output layer too, adjust here.
    o_ref[...] = h.astype(o_ref.dtype)


def _resident_spec(shape, single_buffer):
    """BlockSpec for a block whose index_map is constant across the grid.

    When supported, request single-buffering: default double-buffering would
    duplicate the resident weight stack in VMEM for zero benefit.
    """
    ndim = len(shape)
    index_map = lambda i: (0,) * ndim
    if single_buffer:
        try:
            return pl.BlockSpec(shape, index_map, pipeline_mode=pl.Buffered(1))
        except Exception:
            pass
    return pl.BlockSpec(shape, index_map)


def _pick_tile_m(batch: int) -> int:
    """Batch tile: large enough to amortize the ~0.35us per-step overhead, but
    split into >= 2 tiles whenever possible so v7x's two TensorCores both get
    work (dimension_semantics=("parallel",) shards the grid across them)."""
    if batch >= 1024:
        return 512
    if batch >= 512:
        return 256
    if batch >= 16:
        return _round_up((batch + 1) // 2, 8)
    return _round_up(max(batch, 1), 8)


def _vmem_limit_bytes(tile_m, in_pad, out_pad, w_list, b_list):
    """Explicit scoped-VMEM budget (defaults are 16/32 MiB on v5e / v6e-v7x)."""
    wbytes = sum(int(w.size) * w.dtype.itemsize for w in w_list)
    bbytes = sum(int(b.size) * b.dtype.itemsize for b in b_list)
    max_hid = max(int(w.shape[1]) for w in w_list)
    need = (2 * tile_m * in_pad * 4          # double-buffered input stream
            + 2 * tile_m * out_pad * 4       # double-buffered output stream
            + 2 * (wbytes + bbytes)          # weights (x2 in case single-buffer not honored)
            + 2 * tile_m * max_hid * 4)      # widest intermediate activation
    need = int(need * 1.5) + (4 << 20)       # margin for compiler scratch/spills
    # Clamp to v7x's physical VMEM (64 MiB); never below a sane 32 MiB floor.
    return max(32 << 20, min(need, 64 << 20))


def _fcnn_pallas(x_padded, w_list, b_list, *, tile_m, out_pad, single_buffer_weights):
    m_pad, in_pad = x_padded.shape
    grid = (m_pad // tile_m,)

    wb_inputs, wb_specs = [], []
    for w, b in zip(w_list, b_list):
        wb_inputs += [w, b]
        wb_specs += [_resident_spec(tuple(w.shape), single_buffer_weights),
                     _resident_spec(tuple(b.shape), single_buffer_weights)]

    return pl.pallas_call(
        _fcnn_fused_kernel,
        out_shape=jax.ShapeDtypeStruct((m_pad, out_pad), jnp.float32),
        grid=grid,
        in_specs=[pl.BlockSpec((tile_m, in_pad), lambda i: (i, 0))] + wb_specs,
        out_specs=pl.BlockSpec((tile_m, out_pad), lambda i: (i, 0)),
        compiler_params=pltpu.CompilerParams(
            # Batch tiles are independent -> megacore sharding on v7x,
            # harmless no-op on v5e/v6e (1 TC).
            dimension_semantics=("parallel",),
            vmem_limit_bytes=_vmem_limit_bytes(tile_m, in_pad, out_pad,
                                               w_list, b_list)),
    )(x_padded, *wb_inputs)


# ---------------------------------------------------------------------------
# Parameter construction + host-side packing (done once, outside the hot path)
# ---------------------------------------------------------------------------
def build_fcnn_params(key, in_dim, out_dim, hidden_dim, n_layers):
    """Mimic torch.nn.Linear default init (uniform +-1/sqrt(fan_in))."""
    if isinstance(hidden_dim, int):
        hidden_dim = [hidden_dim] * (n_layers - 2)
    assert len(hidden_dim) == n_layers - 2

    dims = [in_dim] + list(hidden_dim) + [out_dim]
    params = []
    for li in range(len(dims) - 1):
        fan_in, fan_out = dims[li], dims[li + 1]
        key, kw, kb = jax.random.split(key, 3)
        bound = 1.0 / jnp.sqrt(jnp.float32(fan_in))
        # stored already transposed: (in, out) so each layer is y = x @ W + b
        w = jax.random.uniform(kw, (fan_in, fan_out), jnp.float32, -bound, bound)
        b = jax.random.uniform(kb, (fan_out,), jnp.float32, -bound, bound)
        params.append((w, b))
    return params


def pack_fcnn_params(params, in_dim, out_dim, *, lane_multiple=128,
                     weight_dtype=jnp.bfloat16):
    """Per-layer zero-padding to lane multiples; weights cast to bf16.

    Zero padding preserves the math exactly: padded input columns hit zero
    weight rows, padded output columns get zero bias, ReLU(0)=0 propagates.
    NOTE: on v6e/v7x (2x256x256 MXU), lane_multiple=256 lifts MXU utilization
    for layers with real dims >= 128 -- re-check the VMEM budget if you do.
    """
    w_list, b_list = [], []
    for (w, b) in params:
        fi, fo = w.shape
        fi_p, fo_p = _round_up(fi, lane_multiple), _round_up(fo, lane_multiple)
        w_p = jnp.zeros((fi_p, fo_p), weight_dtype).at[:fi, :fo].set(
            w.astype(weight_dtype))
        b_p = jnp.zeros((1, fo_p), jnp.float32).at[0, :fo].set(b)
        w_list.append(w_p)
        b_list.append(b_p)
    return {"w": w_list, "b": b_list, "in_dim": in_dim, "out_dim": out_dim}


def fcnn_forward(packed, x, single_buffer_weights=True):
    """x: (batch, in_dim) -> (batch, out_dim). Single fused Pallas call."""
    w_list, b_list = packed["w"], packed["b"]
    in_dim, out_dim = packed["in_dim"], packed["out_dim"]
    batch = x.shape[0]
    in_pad = int(w_list[0].shape[0])
    out_pad = int(w_list[-1].shape[1])

    tile_m = _pick_tile_m(batch)
    m_pad = _round_up(batch, tile_m)

    # Skip the device-side pad copy when the input is already aligned.
    if batch == m_pad and in_dim == in_pad and x.dtype == jnp.float32:
        x_p = x
    else:
        x_p = jnp.zeros((m_pad, in_pad), jnp.float32).at[:batch, :in_dim].set(
            x.astype(jnp.float32))

    y_p = _fcnn_pallas(x_p, w_list, b_list, tile_m=tile_m, out_pad=out_pad,
                       single_buffer_weights=single_buffer_weights)
    return y_p[:batch, :out_dim]


# ---------------------------------------------------------------------------
if __name__ == "__main__":
    # FCNN-consistent small shapes: in_dim=16, hidden_dim=32, out_dim=4,
    # n_layers=4  ->  hidden dims [32, 32], dense chain 16->32->32->4.
    in_dim, out_dim, hidden_dim, n_layers = 16, 4, 32, 4
    batch = 16   # -> two batch tiles, exercising the parallel grid axis

    key = jax.random.PRNGKey(0)
    key, kx = jax.random.split(key)
    x = jax.random.normal(kx, (batch, in_dim), jnp.float32)

    params = build_fcnn_params(key, in_dim, out_dim, hidden_dim, n_layers)
    packed = pack_fcnn_params(params, in_dim, out_dim)

    fwd = jax.jit(functools.partial(fcnn_forward, packed))
    try:
        out = jax.block_until_ready(fwd(x))
    except Exception:
        # Fall back to default double-buffered weight specs if this JAX/Mosaic
        # build rejects pl.Buffered(1) on a top-level pallas_call.
        fwd = jax.jit(functools.partial(fcnn_forward, packed,
                                        single_buffer_weights=False))
        out = jax.block_until_ready(fwd(x))

    # Pure-JAX reference with matching bf16-operand / f32-accum math.
    ref = x
    for li, (w, b) in enumerate(params):
        ref = jnp.dot(ref.astype(jnp.bfloat16), w.astype(jnp.bfloat16),
                      preferred_element_type=jnp.float32) + b
        if li != len(params) - 1:
            ref = jnp.maximum(ref, 0.0)

    assert out.shape == (batch, out_dim)
    assert jnp.allclose(out, ref, atol=1e-2, rtol=1e-2)

    print("KERNEL_OK")
</pallas_src>

<mosaic_0001>
module attributes {stable_mosaic.version = 11 : i64} {
  func.func @_fcnn_fused_kernel(%arg0: i32, %arg1: memref<8x128xf32, #tpu.memory_space<vmem>>, %arg2: memref<128x128xbf16, #tpu.memory_space<vmem>>, %arg3: memref<1x128xf32, #tpu.memory_space<vmem>>, %arg4: memref<128x128xbf16, #tpu.memory_space<vmem>>, %arg5: memref<1x128xf32, #tpu.memory_space<vmem>>, %arg6: memref<128x128xbf16, #tpu.memory_space<vmem>>, %arg7: memref<1x128xf32, #tpu.memory_space<vmem>>, %arg8: memref<8x128xf32, #tpu.memory_space<vmem>>) attributes {dimension_semantics = [#tpu.dimension_semantics<parallel>], iteration_bounds = array<i64: 2>, scalar_prefetch = 0 : i64, scratch_operands = 0 : i64, tpu.core_type = #tpu.core_type<tc>, window_params = [{transform_indices = @transform_0, window_bounds = array<i64: 8, 128>}, {pipeline_mode = #tpu.pipeline_mode<synchronous>, transform_indices = @transform_1, window_bounds = array<i64: 128, 128>}, {pipeline_mode = #tpu.pipeline_mode<synchronous>, transform_indices = @transform_2, window_bounds = array<i64: 1, 128>}, {pipeline_mode = #tpu.pipeline_mode<synchronous>, transform_indices = @transform_3, window_bounds = array<i64: 128, 128>}, {pipeline_mode = #tpu.pipeline_mode<synchronous>, transform_indices = @transform_4, window_bounds = array<i64: 1, 128>}, {pipeline_mode = #tpu.pipeline_mode<synchronous>, transform_indices = @transform_5, window_bounds = array<i64: 128, 128>}, {pipeline_mode = #tpu.pipeline_mode<synchronous>, transform_indices = @transform_6, window_bounds = array<i64: 1, 128>}, {transform_indices = @transform_7, window_bounds = array<i64: 8, 128>}]} {
    %c0 = arith.constant 0 : index
    %c0_0 = arith.constant 0 : index
    %0 = vector.load %arg1[%c0, %c0_0] : memref<8x128xf32, #tpu.memory_space<vmem>>, vector<8x128xf32>
    %1 = arith.truncf %0 : vector<8x128xf32> to vector<8x128xbf16>
    %c0_1 = arith.constant 0 : index
    %c0_2 = arith.constant 0 : index
    %2 = vector.load %arg2[%c0_1, %c0_2] : memref<128x128xbf16, #tpu.memory_space<vmem>>, vector<128x128xbf16>
    %cst = arith.constant dense<0.000000e+00> : vector<8x128xf32>
    %3 = tpu.matmul %1, %2, %cst {dimension_numbers = #tpu.dot_dimension_numbers<[1], [0], [0], [1], [0, 0, 1, 1], [], []>} : vector<8x128xbf16>, vector<128x128xbf16>, vector<8x128xf32> -> vector<8x128xf32>
    %c0_3 = arith.constant 0 : index
    %c0_4 = arith.constant 0 : index
    %4 = vector.load %arg3[%c0_3, %c0_4] : memref<1x128xf32, #tpu.memory_space<vmem>>, vector<1x128xf32>
    %5 = vector.broadcast %4 : vector<1x128xf32> to vector<8x128xf32>
    %6 = arith.addf %3, %5 : vector<8x128xf32>
    %cst_5 = arith.constant 0.000000e+00 : f32
    %7 = vector.broadcast %cst_5 : f32 to vector<8x128xf32>
    %8 = arith.maximumf %6, %7 : vector<8x128xf32>
    %9 = arith.truncf %8 : vector<8x128xf32> to vector<8x128xbf16>
    %c0_6 = arith.constant 0 : index
    %c0_7 = arith.constant 0 : index
    %10 = vector.load %arg4[%c0_6, %c0_7] : memref<128x128xbf16, #tpu.memory_space<vmem>>, vector<128x128xbf16>
    %cst_8 = arith.constant dense<0.000000e+00> : vector<8x128xf32>
    %11 = tpu.matmul %9, %10, %cst_8 {dimension_numbers = #tpu.dot_dimension_numbers<[1], [0], [0], [1], [0, 0, 1, 1], [], []>} : vector<8x128xbf16>, vector<128x128xbf16>, vector<8x128xf32> -> vector<8x128xf32>
    %c0_9 = arith.constant 0 : index
    %c0_10 = arith.constant 0 : index
    %12 = vector.load %arg5[%c0_9, %c0_10] : memref<1x128xf32, #tpu.memory_space<vmem>>, vector<1x128xf32>
    %13 = vector.broadcast %12 : vector<1x128xf32> to vector<8x128xf32>
    %14 = arith.addf %11, %13 : vector<8x128xf32>
    %cst_11 = arith.constant 0.000000e+00 : f32
    %15 = vector.broadcast %cst_11 : f32 to vector<8x128xf32>
    %16 = arith.maximumf %14, %15 : vector<8x128xf32>
    %17 = arith.truncf %16 : vector<8x128xf32> to vector<8x128xbf16>
    %c0_12 = arith.constant 0 : index
    %c0_13 = arith.constant 0 : index
    %18 = vector.load %arg6[%c0_12, %c0_13] : memref<128x128xbf16, #tpu.memory_space<vmem>>, vector<128x128xbf16>
    %cst_14 = arith.constant dense<0.000000e+00> : vector<8x128xf32>
    %19 = tpu.matmul %17, %18, %cst_14 {dimension_numbers = #tpu.dot_dimension_numbers<[1], [0], [0], [1], [0, 0, 1, 1], [], []>} : vector<8x128xbf16>, vector<128x128xbf16>, vector<8x128xf32> -> vector<8x128xf32>
    %c0_15 = arith.constant 0 : index
    %c0_16 = arith.constant 0 : index
    %20 = vector.load %arg7[%c0_15, %c0_16] : memref<1x128xf32, #tpu.memory_space<vmem>>, vector<1x128xf32>
    %21 = vector.broadcast %20 : vector<1x128xf32> to vector<8x128xf32>
    %22 = arith.addf %19, %21 : vector<8x128xf32>
    %c0_17 = arith.constant 0 : index
    %c0_18 = arith.constant 0 : index
    %23 = vector.load %arg8[%c0_17, %c0_18] : memref<8x128xf32, #tpu.memory_space<vmem>>, vector<8x128xf32>
    tpu.vector_store %arg8[%c0_17, %c0_18], %22 {strides = array<i32>} : memref<8x128xf32, #tpu.memory_space<vmem>>, vector<8x128xf32>,
    return
  }
  func.func @transform_0(%arg0: i32) -> (i32, i32) {
    %c0_i32 = arith.constant 0 : i32
    %c0_i32_0 = arith.constant 0 : i32
    return %arg0, %c0_i32 : i32, i32
  }
  func.func @transform_1(%arg0: i32) -> (i32, i32) {
    %c0_i32 = arith.constant 0 : i32
    %c0_i32_0 = arith.constant 0 : i32
    %c0_i32_1 = arith.constant 0 : i32
    return %c0_i32, %c0_i32_0 : i32, i32
  }
  func.func @transform_2(%arg0: i32) -> (i32, i32) {
    %c0_i32 = arith.constant 0 : i32
    %c0_i32_0 = arith.constant 0 : i32
    %c0_i32_1 = arith.constant 0 : i32
    return %c0_i32, %c0_i32_0 : i32, i32
  }
  func.func @transform_3(%arg0: i32) -> (i32, i32) {
    %c0_i32 = arith.constant 0 : i32
    %c0_i32_0 = arith.constant 0 : i32
    %c0_i32_1 = arith.constant 0 : i32
    return %c0_i32, %c0_i32_0 : i32, i32
  }
  func.func @transform_4(%arg0: i32) -> (i32, i32) {
    %c0_i32 = arith.constant 0 : i32
    %c0_i32_0 = arith.constant 0 : i32
    %c0_i32_1 = arith.constant 0 : i32
    return %c0_i32, %c0_i32_0 : i32, i32
  }
  func.func @transform_5(%arg0: i32) -> (i32, i32) {
    %c0_i32 = arith.constant 0 : i32
    %c0_i32_0 = arith.constant 0 : i32
    %c0_i32_1 = arith.constant 0 : i32
    return %c0_i32, %c0_i32_0 : i32, i32
  }
  func.func @transform_6(%arg0: i32) -> (i32, i32) {
    %c0_i32 = arith.constant 0 : i32
    %c0_i32_0 = arith.constant 0 : i32
    %c0_i32_1 = arith.constant 0 : i32
    return %c0_i32, %c0_i32_0 : i32, i32
  }
  func.func @transform_7(%arg0: i32) -> (i32, i32) {
    %c0_i32 = arith.constant 0 : i32
    %c0_i32_0 = arith.constant 0 : i32
    return %arg0, %c0_i32 : i32, i32
  }
}

module attributes {stable_mosaic.version = 11 : i64} {
  func.func @_fcnn_fused_kernel(%arg0: i32, %arg1: memref<8x128xf32, #tpu.memory_space<vmem>>, %arg2: memref<128x128xbf16, #tpu.memory_space<vmem>>, %arg3: memref<1x128xf32, #tpu.memory_space<vmem>>, %arg4: memref<128x128xbf16, #tpu.memory_space<vmem>>, %arg5: memref<1x128xf32, #tpu.memory_space<vmem>>, %arg6: memref<128x128xbf16, #tpu.memory_space<vmem>>, %arg7: memref<1x128xf32, #tpu.memory_space<vmem>>, %arg8: memref<8x128xf32, #tpu.memory_space<vmem>>) attributes {dimension_semantics = [#tpu.dimension_semantics<parallel>], iteration_bounds = array<i64: 2>, scalar_prefetch = 0 : i64, scratch_operands = 0 : i64, tpu.core_type = #tpu.core_type<tc>, window_params = [{transform_indices = @transform_0, window_bounds = array<i64: 8, 128>}, {pipeline_mode = #tpu.pipeline_mode<synchronous>, transform_indices = @transform_1, window_bounds = array<i64: 128, 128>}, {pipeline_mode = #tpu.pipeline_mode<synchronous>, transform_indices = @transform_2, window_bounds = array<i64: 1, 128>}, {pipeline_mode = #tpu.pipeline_mode<synchronous>, transform_indices = @transform_3, window_bounds = array<i64: 128, 128>}, {pipeline_mode = #tpu.pipeline_mode<synchronous>, transform_indices = @transform_4, window_bounds = array<i64: 1, 128>}, {pipeline_mode = #tpu.pipeline_mode<synchronous>, transform_indices = @transform_5, window_bounds = array<i64: 128, 128>}, {pipeline_mode = #tpu.pipeline_mode<synchronous>, transform_indices = @transform_6, window_bounds = array<i64: 1, 128>}, {transform_indices = @transform_7, window_bounds = array<i64: 8, 128>}]} {
    %c0 = arith.constant 0 : index
    %c0_0 = arith.constant 0 : index
    %0 = vector.load %arg1[%c0, %c0_0] : memref<8x128xf32, #tpu.memory_space<vmem>>, vector<8x128xf32>
    %1 = arith.truncf %0 : vector<8x128xf32> to vector<8x128xbf16>
    %c0_1 = arith.constant 0 : index
    %c0_2 = arith.constant 0 : index
    %2 = vector.load %arg2[%c0_1, %c0_2] : memref<128x128xbf16, #tpu.memory_space<vmem>>, vector<128x128xbf16>
    %cst = arith.constant dense<0.000000e+00> : vector<8x128xf32>
    %3 = tpu.matmul %1, %2, %cst {dimension_numbers = #tpu.dot_dimension_numbers<[1], [0], [0], [1], [0, 0, 1, 1], [], []>} : vector<8x128xbf16>, vector<128x128xbf16>, vector<8x128xf32> -> vector<8x128xf32>
    %c0_3 = arith.constant 0 : index
    %c0_4 = arith.constant 0 : index
    %4 = vector.load %arg3[%c0_3, %c0_4] : memref<1x128xf32, #tpu.memory_space<vmem>>, vector<1x128xf32>
    %5 = vector.broadcast %4 : vector<1x128xf32> to vector<8x128xf32>
    %6 = arith.addf %3, %5 : vector<8x128xf32>
    %cst_5 = arith.constant 0.000000e+00 : f32
    %7 = vector.broadcast %cst_5 : f32 to vector<8x128xf32>
    %8 = arith.maximumf %6, %7 : vector<8x128xf32>
    %9 = arith.truncf %8 : vector<8x128xf32> to vector<8x128xbf16>
    %c0_6 = arith.constant 0 : index
    %c0_7 = arith.constant 0 : index
    %10 = vector.load %arg4[%c0_6, %c0_7] : memref<128x128xbf16, #tpu.memory_space<vmem>>, vector<128x128xbf16>
    %cst_8 = arith.constant dense<0.000000e+00> : vector<8x128xf32>
    %11 = tpu.matmul %9, %10, %cst_8 {dimension_numbers = #tpu.dot_dimension_numbers<[1], [0], [0], [1], [0, 0, 1, 1], [], []>} : vector<8x128xbf16>, vector<128x128xbf16>, vector<8x128xf32> -> vector<8x128xf32>
    %c0_9 = arith.constant 0 : index
    %c0_10 = arith.constant 0 : index
    %12 = vector.load %arg5[%c0_9, %c0_10] : memref<1x128xf32, #tpu.memory_space<vmem>>, vector<1x128xf32>
    %13 = vector.broadcast %12 : vector<1x128xf32> to vector<8x128xf32>
    %14 = arith.addf %11, %13 : vector<8x128xf32>
    %cst_11 = arith.constant 0.000000e+00 : f32
    %15 = vector.broadcast %cst_11 : f32 to vector<8x128xf32>
    %16 = arith.maximumf %14, %15 : vector<8x128xf32>
    %17 = arith.truncf %16 : vector<8x128xf32> to vector<8x128xbf16>
    %c0_12 = arith.constant 0 : index
    %c0_13 = arith.constant 0 : index
    %18 = vector.load %arg6[%c0_12, %c0_13] : memref<128x128xbf16, #tpu.memory_space<vmem>>, vector<128x128xbf16>
    %cst_14 = arith.constant dense<0.000000e+00> : vector<8x128xf32>
    %19 = tpu.matmul %17, %18, %cst_14 {dimension_numbers = #tpu.dot_dimension_numbers<[1], [0], [0], [1], [0, 0, 1, 1], [], []>} : vector<8x128xbf16>, vector<128x128xbf16>, vector<8x128xf32> -> vector<8x128xf32>
    %c0_15 = arith.constant 0 : index
    %c0_16 = arith.constant 0 : index
    %20 = vector.load %arg7[%c0_15, %c0_16] : memref<1x128xf32, #tpu.memory_space<vmem>>, vector<1x128xf32>
    %21 = vector.broadcast %20 : vector<1x128xf32> to vector<8x128xf32>
    %22 = arith.addf %19, %21 : vector<8x128xf32>
    %c0_17 = arith.constant 0 : index
    %c0_18 = arith.constant 0 : index
    %23 = vector.load %arg8[%c0_17, %c0_18] : memref<8x128xf32, #tpu.memory_space<vmem>>, vector<8x128xf32>
    tpu.vector_store %arg8[%c0_17, %c0_18], %22 {strides = array<i32>} : memref<8x128xf32, #tpu.memory_space<vmem>>, vector<8x128xf32>,
    return
  }
  func.func @transform_0(%arg0: i32) -> (i32, i32) {
    %c0_i32 = arith.constant 0 : i32
    %c0_i32_0 = arith.constant 0 : i32
    return %arg0, %c0_i32 : i32, i32
  }
  func.func @transform_1(%arg0: i32) -> (i32, i32) {
    %c0_i32 = arith.constant 0 : i32
    %c0_i32_0 = arith.constant 0 : i32
    %c0_i32_1 = arith.constant 0 : i32
    return %c0_i32, %c0_i32_0 : i32, i32
  }
  func.func @transform_2(%arg0: i32) -> (i32, i32) {
    %c0_i32 = arith.constant 0 : i32
    %c0_i32_0 = arith.constant 0 : i32
    %c0_i32_1 = arith.constant 0 : i32
    return %c0_i32, %c0_i32_0 : i32, i32
  }
  func.func @transform_3(%arg0: i32) -> (i32, i32) {
    %c0_i32 = arith.constant 0 : i32
    %c0_i32_0 = arith.constant 0 : i32
    %c0_i32_1 = arith.constant 0 : i32
    return %c0_i32, %c0_i32_0 : i32, i32
  }
  func.func @transform_4(%arg0: i32) -> (i32, i32) {
    %c0_i32 = arith.constant 0 : i32
    %c0_i32_0 = arith.constant 0 : i32
    %c0_i32_1 = arith.constant 0 : i32
    return %c0_i32, %c0_i32_0 : i32, i32
  }
  func.func @transform_5(%arg0: i32) -> (i32, i32) {
    %c0_i32 = arith.constant 0 : i32
    %c0_i32_0 = arith.constant 0 : i32
    %c0_i32_1 = arith.constant 0 : i32
    return %c0_i32, %c0_i32_0 : i32, i32
  }
  func.func @transform_6(%arg0: i32) -> (i32, i32) {
    %c0_i32 = arith.constant 0 : i32
    %c0_i32_0 = arith.constant 0 : i32
    %c0_i32_1 = arith.constant 0 : i32
    return %c0_i32, %c0_i32_0 : i32, i32
  }
  func.func @transform_7(%arg0: i32) -> (i32, i32) {
    %c0_i32 = arith.constant 0 : i32
    %c0_i32_0 = arith.constant 0 : i32
    return %arg0, %c0_i32 : i32, i32
  }
}

</mosaic_0001>

<bundles_post_ra>
// kernel: fcnn_forward.1
= control target key start
LH: loop header
LB: loop body
LE: loop exit
PB: predicated region body
PF: predicated region fallthrough
CT: control target
= control target key end

     0   :  { %12 = vsyncpa [#allocation3], 0  ;;  %s1185_s0 = inlined_call_operand.vmem [shape: f32[16,128], index: 0, kind: input, shape index: {}]   ;;  %s1186_s1 = inlined_call_operand.hbm [shape: bf16[128,128], index: 1, kind: input, shape index: {}]   ;;  %s1187_s2 = inlined_call_operand.vmem [shape: f32[1,128], index: 2, kind: input, shape index: {}]   ;;  %s1188_s3 = inlined_call_operand.hbm [shape: bf16[128,128], index: 3, kind: input, shape index: {}]   ;;  %s1189_s4 = inlined_call_operand.vmem [shape: f32[1,128], index: 4, kind: input, shape index: {}]   ;;  %s1190_s5 = inlined_call_operand.vmem [shape: bf16[128,128], index: 5, kind: input, shape index: {}]   ;;  %s1191_s6 = inlined_call_operand.vmem [shape: f32[1,128], index: 6, kind: input, shape index: {}]   ;;  %s1192_s7 = inlined_call_operand.vmem [shape: f32[16,128], index: 7, kind: output, shape index: {}]  }
   0x1   :  { %13 = vsyncpa [#allocation5], 0  ;;  %s1022_s24 = smov 0  }
   0x2 LB: > { %s1028_s25 = sadd.s32 4294967295, %s974_s24   ;;  %p722_p0 = scmp.ge.s32.totalorder %s974_s24, 1  ;;  %s974_s24 = sphi %s1022_s24, %s19_s24  }
   0x3   : > { %p202_p1 = scmp.lt.s32.totalorder %s974_s24, 3  ;;  %s976_s26 = smov [#allocation2]  }
   0x4   : > { %s214_s27 = sshll.u32 %s976_s26, 4  ;;  %p1193_p3 = scmp.eq.s32.totalorder %s1028_s25, 0  ;;  %s215_s27 = int_to_ptr.vmem [resolvable:$true] %s214_s27 }
   0x5   : > { %p1032_p2 = pnand %p722_p0, %p202_p1  ;;  %s977_s29 = smov [#allocation4]  }
   0x6   : > { %s230_s30 = sshll.u32 %s977_s29, 4  ;;  %s904_s11 = scalar_lea.hbm %s1186_s1, 1024  ;;  %s1045_s30 = int_to_ptr.vmem [resolvable:$true] %s230_s30 }
   0x7   : > { %s1195_s28 = scalar_select %p1032_p2, 1, 0 }
   0x8   : > { %p855_p4 = pneg %p1032_p2  ;;  %p905_p6 = scmp.ne.s32.totalorder %s1186_s1, %s904_s11 }
   0x9   : > { %p911_p10 = scmp.lt.u32.totalorder %s904_s11, %s1186_s1 }
   0xa   : > { %p1041_p5 = pnand %p1193_p3, %p855_p4 }
   0xc   : > { %p906_p7 = pneg %p1041_p5 }
   0xe   : > { %p907_p8 = pnand %p906_p7, %p905_p6 }
  0x10   : > { %p908_p9 = pneg %p907_p8 }
  0x12   : > { %p913_p11 = pnand %p911_p10, %p908_p9 }
  0x14   : > { %916 = shalt.err (!%p913_p11)
}
  0x15   : > { %s917_s16 = scalar_lea.vmem %s215_s27, 1024  ;;  %p925_p1 = scmp.lt.s32.totalorder %s215_s27, %s215_s27 }
  0x16   : > { %p918_p12 = scmp.ne.s32.totalorder %s215_s27, %s917_s16  ;;  %p926_p4 = scmp.lt.s32.totalorder %s917_s16, %s917_s16 }
  0x18   : > { %p920_p13 = pnand %p918_p12, %p906_p7  ;;  %p927_p3 = por %p926_p4, %p925_p1 }
  0x1a   : > { %p921_p0 = pneg %p920_p13 }
  0x1c   : > { %p928_p2 = pnand %p927_p3, %p921_p0 }
  0x1e   : > { %931 = shalt.err (!%p928_p2)
}
  0x1f   : > { %s978_s17 = smov 64   ;;  %s979_s18 = smov 4  }
  0x20   : > { %858 = dma.hbm_to_vmem [thread:$0]  (!%p1041_p5), %s1186_s1, 1024, %s215_s27, [#allocation3], %s978_s17, %s978_s17, %s979_s18  }
  0x21   : > { %s932_s23 = scalar_lea.hbm %s1188_s3, 1024 }
  0x22   : > { %p933_p6 = scmp.ne.s32.totalorder %s1188_s3, %s932_s23  ;;  %p939_p8 = scmp.lt.u32.totalorder %s932_s23, %s1188_s3 }
  0x24   : > { %p935_p2 = pnand %p933_p6, %p906_p7 }
  0x26   : > { %p936_p3 = pneg %p935_p2 }
  0x28   : > { %p941_p9 = pnand %p939_p8, %p936_p3 }
  0x2a   : > { %944 = shalt.err (!%p941_p9)
}
  0x2b   : > { %s945_s27 = scalar_lea.vmem %s1045_s30, 1024  ;;  %p953_p13 = scmp.lt.s32.totalorder %s1045_s30, %s1045_s30 }
  0x2c   : > { %p946_p10 = scmp.ne.s32.totalorder %s1045_s30, %s945_s27  ;;  %p954_p0 = scmp.lt.s32.totalorder %s945_s27, %s945_s27 }
  0x2e   : > { %p948_p11 = pnand %p946_p10, %p906_p7  ;;  %p955_p1 = por %p954_p0, %p953_p13 }
  0x30   : > { %p949_p12 = pneg %p948_p11 }
  0x32   : > { %p956_p4 = pnand %p955_p1, %p949_p12 }
  0x34   : > { %959 = shalt.err (!%p956_p4)
}
  0x35   : > { %861 = dma.hbm_to_vmem [thread:$0]  (!%p1041_p5), %s1188_s3, 1024, %s1045_s30, [#allocation5], %s978_s17, %s978_s17, %s979_s18  }
  0x36   : > { %p1197_p6 = scmp.ne.s32.totalorder %s1195_s28, 0 }
  0x37   : > { %p1198_p2 = scmp.eq.s32.totalorder (!%p1197_p6), %s1028_s25, 0 }
  0x38   : > { %262 = sbr.rel (%p1197_p6) target bundleno = 752 (0x2f0), region = 48 }
  0x3f   : > { %965 = dma.done.wait (%p1198_p2), [#allocation3], 1024   ;;  %p1199_p7 = pmov %p1198_p2 }
  0x40   : > { %p1200_p3 = pmov %p1198_p2 }
  0x41   : > { %967 = vsyncadd (%p1199_p7), [#allocation3], 4294966272 }
  0x42   : > { %969 = dma.done.wait (%p1200_p3), [#allocation5], 1024   ;;  %p1201_p8 = pmov %p1198_p2 }
  0x43   : > { %v980_v0 = vmov 0.0   ;;  %vm981_vm0 = vmmov 0   ;;  %v880_v1 = vld [vmem:[#allocation2] sm:$0xff]   ;;  %v881_v2 = vld [vmem:[#allocation2 + $0x8] sm:$0xff]   ;;  %v882_v3 = vld [vmem:[#allocation2 + $0x10] sm:$0xff]   ;;  %p296_p5 = scmp.lt.s32.totalorder %s1028_s25, 1 }
  0x44   : > { %971 = vsyncadd (%p1201_p8), [#allocation5], 4294966272  ;;  %787 = vmatprep.subr.bf16.mxu0 %v980_v0  ;;  %803 = vmatprep.mubr.msk.bf16.mxu0 %vm981_vm0, %v980_v0  ;;  %v888_v4 = vld [vmem:[#allocation4] sm:$0xff]   ;;  %v883_v5 = vld [vmem:[#allocation2 + $0x18] sm:$0xff]  }
  0x45   : > { %807 = vmatprep.subr.bf16.mxu1 %v980_v0  ;;  %823 = vmatprep.mubr.msk.bf16.mxu1 %vm981_vm0, %v980_v0  ;;  %s1203_s25 = smov (!%p296_p5, %s1028_s25), 1  ;;  %v889_v6 = vld [vmem:[#allocation4 + $0x8] sm:$0xff]   ;;  %v884_v7 = vld [vmem:[#allocation2 + $0x20] sm:$0xff]   ;;  %v890_v8 = vld [vmem:[#allocation4 + $0x10] sm:$0xff]  }
  0x46   : > { %788 = vmatpush3.bf16.msra.mxu0 %v880_v1  ;;  %808 = vmatpush3.bf16.msra.mxu1 %v888_v4  ;;  %s729_s28 = sshll.u32 %s1203_s25, 3  ;;  %v885_v9 = vld [vmem:[#allocation2 + $0x28] sm:$0xff]   ;;  %v891_v10 = vld [vmem:[#allocation4 + $0x18] sm:$0xff]   ;;  %v886_v11 = vld [vmem:[#allocation2 + $0x30] sm:$0xff]  }
  0x47   : > { %789 = vmatprep.subr.bf16.mxu0 %v980_v0  ;;  %809 = vmatprep.subr.bf16.mxu1 %v980_v0  ;;  %s299_s13 = scalar_lea.vmem %s1185_s0, %s729_s28  ;;  %v892_v12 = vld [vmem:[#allocation4 + $0x20] sm:$0xff]   ;;  %v887_v13 = vld [vmem:[#allocation2 + $0x38] sm:$0xff]   ;;  %v893_v15 = vld [vmem:[#allocation4 + $0x28] sm:$0xff]   ;;  %s303_s18 = scalar_lea.vmem %s1192_s7, %s729_s28 }
  0x48   : > { %v305_v14 = vld [vmem:[%s299_s13] sm:$0xff]  ;;  %v894_v17 = vld [vmem:[#allocation4 + $0x30] sm:$0xff]   ;;  %v895_v18 = vld [vmem:[#allocation4 + $0x38] sm:$0xff]  }
  0x49   : > { %v306_v16 = vpack.c.bf16 %v305_v14, %v305_v14  ;;  %v896_v19 = vld [vmem:[%s1190_s5] sm:$0xff]   ;;  %v897_v20 = vld [vmem:[%s1190_s5 + $0x8] sm:$0xff]   ;;  %v898_v21 = vld [vmem:[%s1190_s5 + $0x10] sm:$0xff]  }
  0x4a   : > { %790 = vmatpush3.bf16.msra.mxu0 %v881_v2  ;;  %810 = vmatpush3.bf16.msra.mxu1 %v889_v6  ;;  %v899_v22 = vld [vmem:[%s1190_s5 + $0x18] sm:$0xff]   ;;  %v900_v23 = vld [vmem:[%s1190_s5 + $0x20] sm:$0xff]   ;;  %v901_v24 = vld [vmem:[%s1190_s5 + $0x28] sm:$0xff]  }
  0x4b   : > { %791 = vmatprep.subr.bf16.mxu0 %v980_v0  ;;  %811 = vmatprep.subr.bf16.mxu1 %v980_v0  ;;  %v731_v25 = vld [vmem:[%s1187_s2] ss:$0 sm:$0xff]  ;;  %v902_v33 = vld [vmem:[%s1190_s5 + $0x30] sm:$0xff]   ;;  %v903_v34 = vld [vmem:[%s1190_s5 + $0x38] sm:$0xff]  }
  0x4c   : > { %v740_v35 = vld [vmem:[%s1189_s4] ss:$0 sm:$0xff] }
  0x4d   : > { %v749_v43 = vld [vmem:[%s1191_s6] ss:$0 sm:$0xff] }
  0x4e   : > { %792 = vmatpush3.bf16.msra.mxu0 %v882_v3  ;;  %812 = vmatpush3.bf16.msra.mxu1 %v890_v8 }
  0x4f   : > { %793 = vmatprep.subr.bf16.mxu0 %v980_v0  ;;  %813 = vmatprep.subr.bf16.mxu1 %v980_v0 }
  0x52   : > { %794 = vmatpush3.bf16.msra.mxu0 %v883_v5  ;;  %814 = vmatpush3.bf16.msra.mxu1 %v891_v10 }
  0x53   : > { %795 = vmatprep.subr.bf16.mxu0 %v980_v0  ;;  %815 = vmatprep.subr.bf16.mxu1 %v980_v0 }
  0x56   : > { %796 = vmatpush3.bf16.msra.mxu0 %v884_v7  ;;  %816 = vmatpush3.bf16.msra.mxu1 %v892_v12 }
  0x57   : > { %797 = vmatprep.subr.bf16.mxu0 %v980_v0  ;;  %817 = vmatprep.subr.bf16.mxu1 %v980_v0 }
  0x5a   : > { %798 = vmatpush3.bf16.msra.mxu0 %v885_v9  ;;  %818 = vmatpush3.bf16.msra.mxu1 %v893_v15 }
  0x5b   : > { %799 = vmatprep.subr.bf16.mxu0 %v980_v0  ;;  %819 = vmatprep.subr.bf16.mxu1 %v980_v0 }
  0x5e   : > { %800 = vmatpush3.bf16.msra.mxu0 %v886_v11  ;;  %820 = vmatpush3.bf16.msra.mxu1 %v894_v17 }
  0x5f   : > { %801 = vmatprep.subr.bf16.mxu0 %v980_v0  ;;  %821 = vmatprep.subr.bf16.mxu1 %v980_v0 }
  0x62   : > { %802 = vmatpush3.bf16.msra.mxu0 %v887_v13  ;;  %822 = vmatpush3.bf16.msra.mxu1 %v895_v18 }
  0x63   : > { %827 = vmatprep.subr.bf16.mxu0 %v980_v0 }
  0x65   : > { %804 = vmatmul.mubr.bf16.vlgmr.msra.gmra.mrb[0].mxu0 %v306_v16 }
  0x66   : > { %843 = vmatprep.mubr.msk.bf16.mxu0 %vm981_vm0, %v980_v0  ;;  %828 = vmatpush3.bf16.msra.mxu0 %v896_v19 }
  0x67   : > { %829 = vmatprep.subr.bf16.mxu0 %v980_v0 }
  0x6a   : > { %830 = vmatpush3.bf16.msra.mxu0 %v897_v20 }
  0x6b   : > { %831 = vmatprep.subr.bf16.mxu0 %v980_v0 }
  0x6e   : > { %832 = vmatpush3.bf16.msra.mxu0 %v898_v21 }
  0x6f   : > { %833 = vmatprep.subr.bf16.mxu0 %v980_v0 }
  0x72   : > { %834 = vmatpush3.bf16.msra.mxu0 %v899_v22 }
  0x73   : > { %835 = vmatprep.subr.bf16.mxu0 %v980_v0 }
  0x76   : > { %836 = vmatpush3.bf16.msra.mxu0 %v900_v23 }
  0x77   : > { %837 = vmatprep.subr.bf16.mxu0 %v980_v0 }
  0x7a   : > { %838 = vmatpush3.bf16.msra.mxu0 %v901_v24 }
  0x7b   : > { %839 = vmatprep.subr.bf16.mxu0 %v980_v0 }
  0x7e   : > { %840 = vmatpush3.bf16.msra.mxu0 %v902_v33 }
  0x7f   : > { %841 = vmatprep.subr.bf16.mxu0 %v980_v0 }
  0x82   : > { %842 = vmatpush3.bf16.msra.mxu0 %v903_v34 }
 0x138   : > { %v412_v26 = vpop.f32.mrb[0].mxu0 }
 0x139   : > { %v413_v27 = vadd.f32 %v731_v25, %v412_v26  ;;  %v805_v28 = vpop.f32.mrb[1].mxu0 }
 0x13a   : > { %v415_v29 = vpop.f32.mrb[2].mxu0 }
 0x13b   : > { %v418_v30 = vmax.f32 %v413_v27, 0.0  ;;  %v806_v31 = vpop.f32.mrb[3].mxu0 }
 0x13d   : > { %v419_v32 = vpack.c.bf16 %v418_v30, %v418_v30 }
 0x13f   : > { %824 = vmatmul.mubr.bf16.vlgmr.msra.gmra.mrb[0].mxu1 %v419_v32 }
 0x212   : > { %v525_v36 = vpop.f32.mrb[0].mxu1 }
 0x213   : > { %v526_v37 = vadd.f32 %v740_v35, %v525_v36  ;;  %v825_v38 = vpop.f32.mrb[1].mxu1 }
 0x214   : > { %v528_v39 = vpop.f32.mrb[2].mxu1 }
 0x215   : > { %v531_v40 = vmax.f32 %v526_v37, 0.0  ;;  %v826_v41 = vpop.f32.mrb[3].mxu1 }
 0x217   : > { %v532_v42 = vpack.c.bf16 %v531_v40, %v531_v40 }
 0x219   : > { %844 = vmatmul.mubr.bf16.vlgmr.msra.gmra.mrb[4].mxu0 %v532_v42 }
 0x2ec   : > { %v638_v44 = vpop.f32.mrb[4].mxu0 }
 0x2ed   : > { %v639_v45 = vadd.f32 %v749_v43, %v638_v44  ;;  %v845_v46 = vpop.f32.mrb[5].mxu0 }
 0x2ee   : > { %v641_v47 = vpop.f32.mrb[6].mxu0 }
 0x2ef   : > { %644 = vst [vmem:[%s303_s18] sm:$0xff] %v639_v45  ;;  %v846_v48 = vpop.f32.mrb[7].mxu0 }
 0x2f0 PF: > { %s19_s24 = sadd.s32 1, %s974_s24  }
 0x2f1   : > { %p16_p9 = scmp.ge.s32.totalorder %s19_s24, 4  }
 0x2f3   :  { %18 = sbr.rel (!%p16_p9) target bundleno = 2 (0x2), region = 87 }
 0x2fa   :  { %664 = vsyncpa [#allocation3], 1 }
 0x2fb   :  { %666 = vsyncpa [#allocation3 + $0x1], 1 }
 0x2fc   :  { %667 = vsyncpa [#allocation5], 1 }

// kernel: fcnn_forward.1
= control target key start
LH: loop header
LB: loop body
LE: loop exit
PB: predicated region body
PF: predicated region fallthrough
CT: control target
= control target key end

     0   :  { %12 = vsyncpa [#allocation3], 0  ;;  %s1185_s0 = inlined_call_operand.vmem [shape: f32[16,128], index: 0, kind: input, shape index: {}]   ;;  %s1186_s1 = inlined_call_operand.hbm [shape: bf16[128,128], index: 1, kind: input, shape index: {}]   ;;  %s1187_s2 = inlined_call_operand.vmem [shape: f32[1,128], index: 2, kind: input, shape index: {}]   ;;  %s1188_s3 = inlined_call_operand.hbm [shape: bf16[128,128], index: 3, kind: input, shape index: {}]   ;;  %s1189_s4 = inlined_call_operand.vmem [shape: f32[1,128], index: 4, kind: input, shape index: {}]   ;;  %s1190_s5 = inlined_call_operand.vmem [shape: bf16[128,128], index: 5, kind: input, shape index: {}]   ;;  %s1191_s6 = inlined_call_operand.vmem [shape: f32[1,128], index: 6, kind: input, shape index: {}]   ;;  %s1192_s7 = inlined_call_operand.vmem [shape: f32[16,128], index: 7, kind: output, shape index: {}]  }
   0x1   :  { %13 = vsyncpa [#allocation5], 0  ;;  %s1022_s24 = smov 0  }
   0x2 LB: > { %s1028_s25 = sadd.s32 4294967295, %s974_s24   ;;  %p722_p0 = scmp.ge.s32.totalorder %s974_s24, 1  ;;  %s974_s24 = sphi %s1022_s24, %s19_s24  }
   0x3   : > { %p202_p1 = scmp.lt.s32.totalorder %s974_s24, 3  ;;  %s976_s26 = smov [#allocation2]  }
   0x4   : > { %s214_s27 = sshll.u32 %s976_s26, 4  ;;  %p1193_p3 = scmp.eq.s32.totalorder %s1028_s25, 0  ;;  %s215_s27 = int_to_ptr.vmem [resolvable:$true] %s214_s27 }
   0x5   : > { %p1032_p2 = pnand %p722_p0, %p202_p1  ;;  %s977_s29 = smov [#allocation4]  }
   0x6   : > { %s230_s30 = sshll.u32 %s977_s29, 4  ;;  %s904_s11 = scalar_lea.hbm %s1186_s1, 1024  ;;  %s1045_s30 = int_to_ptr.vmem [resolvable:$true] %s230_s30 }
   0x7   : > { %s1195_s28 = scalar_select %p1032_p2, 1, 0 }
   0x8   : > { %p855_p4 = pneg %p1032_p2  ;;  %p905_p6 = scmp.ne.s32.totalorder %s1186_s1, %s904_s11 }
   0x9   : > { %p911_p10 = scmp.lt.u32.totalorder %s904_s11, %s1186_s1 }
   0xa   : > { %p1041_p5 = pnand %p1193_p3, %p855_p4 }
   0xc   : > { %p906_p7 = pneg %p1041_p5 }
   0xe   : > { %p907_p8 = pnand %p906_p7, %p905_p6 }
  0x10   : > { %p908_p9 = pneg %p907_p8 }
  0x12   : > { %p913_p11 = pnand %p911_p10, %p908_p9 }
  0x14   : > { %916 = shalt.err (!%p913_p11)
}
  0x15   : > { %s917_s16 = scalar_lea.vmem %s215_s27, 1024  ;;  %p925_p1 = scmp.lt.s32.totalorder %s215_s27, %s215_s27 }
  0x16   : > { %p918_p12 = scmp.ne.s32.totalorder %s215_s27, %s917_s16  ;;  %p926_p4 = scmp.lt.s32.totalorder %s917_s16, %s917_s16 }
  0x18   : > { %p920_p13 = pnand %p918_p12, %p906_p7  ;;  %p927_p3 = por %p926_p4, %p925_p1 }
  0x1a   : > { %p921_p0 = pneg %p920_p13 }
  0x1c   : > { %p928_p2 = pnand %p927_p3, %p921_p0 }
  0x1e   : > { %931 = shalt.err (!%p928_p2)
}
  0x1f   : > { %s978_s17 = smov 64   ;;  %s979_s18 = smov 4  }
  0x20   : > { %858 = dma.hbm_to_vmem [thread:$0]  (!%p1041_p5), %s1186_s1, 1024, %s215_s27, [#allocation3], %s978_s17, %s978_s17, %s979_s18  }
  0x21   : > { %s932_s23 = scalar_lea.hbm %s1188_s3, 1024 }
  0x22   : > { %p933_p6 = scmp.ne.s32.totalorder %s1188_s3, %s932_s23  ;;  %p939_p8 = scmp.lt.u32.totalorder %s932_s23, %s1188_s3 }
  0x24   : > { %p935_p2 = pnand %p933_p6, %p906_p7 }
  0x26   : > { %p936_p3 = pneg %p935_p2 }
  0x28   : > { %p941_p9 = pnand %p939_p8, %p936_p3 }
  0x2a   : > { %944 = shalt.err (!%p941_p9)
}
  0x2b   : > { %s945_s27 = scalar_lea.vmem %s1045_s30, 1024  ;;  %p953_p13 = scmp.lt.s32.totalorder %s1045_s30, %s1045_s30 }
  0x2c   : > { %p946_p10 = scmp.ne.s32.totalorder %s1045_s30, %s945_s27  ;;  %p954_p0 = scmp.lt.s32.totalorder %s945_s27, %s945_s27 }
  0x2e   : > { %p948_p11 = pnand %p946_p10, %p906_p7  ;;  %p955_p1 = por %p954_p0, %p953_p13 }
  0x30   : > { %p949_p12 = pneg %p948_p11 }
  0x32   : > { %p956_p4 = pnand %p955_p1, %p949_p12 }
  0x34   : > { %959 = shalt.err (!%p956_p4)
}
  0x35   : > { %861 = dma.hbm_to_vmem [thread:$0]  (!%p1041_p5), %s1188_s3, 1024, %s1045_s30, [#allocation5], %s978_s17, %s978_s17, %s979_s18  }
  0x36   : > { %p1197_p6 = scmp.ne.s32.totalorder %s1195_s28, 0 }
  0x37   : > { %p1198_p2 = scmp.eq.s32.totalorder (!%p1197_p6), %s1028_s25, 0 }
  0x38   : > { %262 = sbr.rel (%p1197_p6) target bundleno = 752 (0x2f0), region = 48 }
  0x3f   : > { %965 = dma.done.wait (%p1198_p2), [#allocation3], 1024   ;;  %p1199_p7 = pmov %p1198_p2 }
  0x40   : > { %p1200_p3 = pmov %p1198_p2 }
  0x41   : > { %967 = vsyncadd (%p1199_p7), [#allocation3], 4294966272 }
  0x42   : > { %969 = dma.done.wait (%p1200_p3), [#allocation5], 1024   ;;  %p1201_p8 = pmov %p1198_p2 }
  0x43   : > { %v980_v0 = vmov 0.0   ;;  %vm981_vm0 = vmmov 0   ;;  %v880_v1 = vld [vmem:[#allocation2] sm:$0xff]   ;;  %v881_v2 = vld [vmem:[#allocation2 + $0x8] sm:$0xff]   ;;  %v882_v3 = vld [vmem:[#allocation2 + $0x10] sm:$0xff]   ;;  %p296_p5 = scmp.lt.s32.totalorder %s1028_s25, 1 }
  0x44   : > { %971 = vsyncadd (%p1201_p8), [#allocation5], 4294966272  ;;  %787 = vmatprep.subr.bf16.mxu0 %v980_v0  ;;  %803 = vmatprep.mubr.msk.bf16.mxu0 %vm981_vm0, %v980_v0  ;;  %v888_v4 = vld [vmem:[#allocation4] sm:$0xff]   ;;  %v883_v5 = vld [vmem:[#allocation2 + $0x18] sm:$0xff]  }
  0x45   : > { %807 = vmatprep.subr.bf16.mxu1 %v980_v0  ;;  %823 = vmatprep.mubr.msk.bf16.mxu1 %vm981_vm0, %v980_v0  ;;  %s1203_s25 = smov (!%p296_p5, %s1028_s25), 1  ;;  %v889_v6 = vld [vmem:[#allocation4 + $0x8] sm:$0xff]   ;;  %v884_v7 = vld [vmem:[#allocation2 + $0x20] sm:$0xff]   ;;  %v890_v8 = vld [vmem:[#allocation4 + $0x10] sm:$0xff]  }
  0x46   : > { %788 = vmatpush3.bf16.msra.mxu0 %v880_v1  ;;  %808 = vmatpush3.bf16.msra.mxu1 %v888_v4  ;;  %s729_s28 = sshll.u32 %s1203_s25, 3  ;;  %v885_v9 = vld [vmem:[#allocation2 + $0x28] sm:$0xff]   ;;  %v891_v10 = vld [vmem:[#allocation4 + $0x18] sm:$0xff]   ;;  %v886_v11 = vld [vmem:[#allocation2 + $0x30] sm:$0xff]  }
  0x47   : > { %789 = vmatprep.subr.bf16.mxu0 %v980_v0  ;;  %809 = vmatprep.subr.bf16.mxu1 %v980_v0  ;;  %s299_s13 = scalar_lea.vmem %s1185_s0, %s729_s28  ;;  %v892_v12 = vld [vmem:[#allocation4 + $0x20] sm:$0xff]   ;;  %v887_v13 = vld [vmem:[#allocation2 + $0x38] sm:$0xff]   ;;  %v893_v15 = vld [vmem:[#allocation4 + $0x28] sm:$0xff]   ;;  %s303_s18 = scalar_lea.vmem %s1192_s7, %s729_s28 }
  0x48   : > { %v305_v14 = vld [vmem:[%s299_s13] sm:$0xff]  ;;  %v894_v17 = vld [vmem:[#allocation4 + $0x30] sm:$0xff]   ;;  %v895_v18 = vld [vmem:[#allocation4 + $0x38] sm:$0xff]  }
  0x49   : > { %v306_v16 = vpack.c.bf16 %v305_v14, %v305_v14  ;;  %v896_v19 = vld [vmem:[%s1190_s5] sm:$0xff]   ;;  %v897_v20 = vld [vmem:[%s1190_s5 + $0x8] sm:$0xff]   ;;  %v898_v21 = vld [vmem:[%s1190_s5 + $0x10] sm:$0xff]  }
  0x4a   : > { %790 = vmatpush3.bf16.msra.mxu0 %v881_v2  ;;  %810 = vmatpush3.bf16.msra.mxu1 %v889_v6  ;;  %v899_v22 = vld [vmem:[%s1190_s5 + $0x18] sm:$0xff]   ;;  %v900_v23 = vld [vmem:[%s1190_s5 + $0x20] sm:$0xff]   ;;  %v901_v24 = vld [vmem:[%s1190_s5 + $0x28] sm:$0xff]  }
  0x4b   : > { %791 = vmatprep.subr.bf16.mxu0 %v980_v0  ;;  %811 = vmatprep.subr.bf16.mxu1 %v980_v0  ;;  %v731_v25 = vld [vmem:[%s1187_s2] ss:$0 sm:$0xff]  ;;  %v902_v33 = vld [vmem:[%s1190_s5 + $0x30] sm:$0xff]   ;;  %v903_v34 = vld [vmem:[%s1190_s5 + $0x38] sm:$0xff]  }
  0x4c   : > { %v740_v35 = vld [vmem:[%s1189_s4] ss:$0 sm:$0xff] }
  0x4d   : > { %v749_v43 = vld [vmem:[%s1191_s6] ss:$0 sm:$0xff] }
  0x4e   : > { %792 = vmatpush3.bf16.msra.mxu0 %v882_v3  ;;  %812 = vmatpush3.bf16.msra.mxu1 %v890_v8 }
  0x4f   : > { %793 = vmatprep.subr.bf16.mxu0 %v980_v0  ;;  %813 = vmatprep.subr.bf16.mxu1 %v980_v0 }
  0x52   : > { %794 = vmatpush3.bf16.msra.mxu0 %v883_v5  ;;  %814 = vmatpush3.bf16.msra.mxu1 %v891_v10 }
  0x53   : > { %795 = vmatprep.subr.bf16.mxu0 %v980_v0  ;;  %815 = vmatprep.subr.bf16.mxu1 %v980_v0 }
  0x56   : > { %796 = vmatpush3.bf16.msra.mxu0 %v884_v7  ;;  %816 = vmatpush3.bf16.msra.mxu1 %v892_v12 }
  0x57   : > { %797 = vmatprep.subr.bf16.mxu0 %v980_v0  ;;  %817 = vmatprep.subr.bf16.mxu1 %v980_v0 }
  0x5a   : > { %798 = vmatpush3.bf16.msra.mxu0 %v885_v9  ;;  %818 = vmatpush3.bf16.msra.mxu1 %v893_v15 }
  0x5b   : > { %799 = vmatprep.subr.bf16.mxu0 %v980_v0  ;;  %819 = vmatprep.subr.bf16.mxu1 %v980_v0 }
  0x5e   : > { %800 = vmatpush3.bf16.msra.mxu0 %v886_v11  ;;  %820 = vmatpush3.bf16.msra.mxu1 %v894_v17 }
  0x5f   : > { %801 = vmatprep.subr.bf16.mxu0 %v980_v0  ;;  %821 = vmatprep.subr.bf16.mxu1 %v980_v0 }
  0x62   : > { %802 = vmatpush3.bf16.msra.mxu0 %v887_v13  ;;  %822 = vmatpush3.bf16.msra.mxu1 %v895_v18 }
  0x63   : > { %827 = vmatprep.subr.bf16.mxu0 %v980_v0 }
  0x65   : > { %804 = vmatmul.mubr.bf16.vlgmr.msra.gmra.mrb[0].mxu0 %v306_v16 }
  0x66   : > { %843 = vmatprep.mubr.msk.bf16.mxu0 %vm981_vm0, %v980_v0  ;;  %828 = vmatpush3.bf16.msra.mxu0 %v896_v19 }
  0x67   : > { %829 = vmatprep.subr.bf16.mxu0 %v980_v0 }
  0x6a   : > { %830 = vmatpush3.bf16.msra.mxu0 %v897_v20 }
  0x6b   : > { %831 = vmatprep.subr.bf16.mxu0 %v980_v0 }
  0x6e   : > { %832 = vmatpush3.bf16.msra.mxu0 %v898_v21 }
  0x6f   : > { %833 = vmatprep.subr.bf16.mxu0 %v980_v0 }
  0x72   : > { %834 = vmatpush3.bf16.msra.mxu0 %v899_v22 }
  0x73   : > { %835 = vmatprep.subr.bf16.mxu0 %v980_v0 }
  0x76   : > { %836 = vmatpush3.bf16.msra.mxu0 %v900_v23 }
  0x77   : > { %837 = vmatprep.subr.bf16.mxu0 %v980_v0 }
  0x7a   : > { %838 = vmatpush3.bf16.msra.mxu0 %v901_v24 }
  0x7b   : > { %839 = vmatprep.subr.bf16.mxu0 %v980_v0 }
  0x7e   : > { %840 = vmatpush3.bf16.msra.mxu0 %v902_v33 }
  0x7f   : > { %841 = vmatprep.subr.bf16.mxu0 %v980_v0 }
  0x82   : > { %842 = vmatpush3.bf16.msra.mxu0 %v903_v34 }
 0x138   : > { %v412_v26 = vpop.f32.mrb[0].mxu0 }
 0x139   : > { %v413_v27 = vadd.f32 %v731_v25, %v412_v26  ;;  %v805_v28 = vpop.f32.mrb[1].mxu0 }
 0x13a   : > { %v415_v29 = vpop.f32.mrb[2].mxu0 }
 0x13b   : > { %v418_v30 = vmax.f32 %v413_v27, 0.0  ;;  %v806_v31 = vpop.f32.mrb[3].mxu0 }
 0x13d   : > { %v419_v32 = vpack.c.bf16 %v418_v30, %v418_v30 }
 0x13f   : > { %824 = vmatmul.mubr.bf16.vlgmr.msra.gmra.mrb[0].mxu1 %v419_v32 }
 0x212   : > { %v525_v36 = vpop.f32.mrb[0].mxu1 }
 0x213   : > { %v526_v37 = vadd.f32 %v740_v35, %v525_v36  ;;  %v825_v38 = vpop.f32.mrb[1].mxu1 }
 0x214   : > { %v528_v39 = vpop.f32.mrb[2].mxu1 }
 0x215   : > { %v531_v40 = vmax.f32 %v526_v37, 0.0  ;;  %v826_v41 = vpop.f32.mrb[3].mxu1 }
 0x217   : > { %v532_v42 = vpack.c.bf16 %v531_v40, %v531_v40 }
 0x219   : > { %844 = vmatmul.mubr.bf16.vlgmr.msra.gmra.mrb[4].mxu0 %v532_v42 }
 0x2ec   : > { %v638_v44 = vpop.f32.mrb[4].mxu0 }
 0x2ed   : > { %v639_v45 = vadd.f32 %v749_v43, %v638_v44  ;;  %v845_v46 = vpop.f32.mrb[5].mxu0 }
 0x2ee   : > { %v641_v47 = vpop.f32.mrb[6].mxu0 }
 0x2ef   : > { %644 = vst [vmem:[%s303_s18] sm:$0xff] %v639_v45  ;;  %v846_v48 = vpop.f32.mrb[7].mxu0 }
 0x2f0 PF: > { %s19_s24 = sadd.s32 1, %s974_s24  }
 0x2f1   : > { %p16_p9 = scmp.ge.s32.totalorder %s19_s24, 4  }
 0x2f3   :  { %18 = sbr.rel (!%p16_p9) target bundleno = 2 (0x2), region = 87 }
 0x2fa   :  { %664 = vsyncpa [#allocation3], 1 }
 0x2fb   :  { %666 = vsyncpa [#allocation3 + $0x1], 1 }
 0x2fc   :  { %667 = vsyncpa [#allocation5], 1 }

</bundles_post_ra>
